<compile_context>
chip_gen: v6e
topology: v6e:2x2x1
jax: 0.10.0
libtpu: 0.0.40
codegen_flags: <defaults>
</compile_context>

<pallas_src>
import functools

import jax
import jax.numpy as jnp
from jax import lax
from jax.experimental import pallas as pl
from jax.experimental.pallas import tpu as pltpu

_LANE = 128
_NODE_TILE = 512                       # target tm / tk on the node axes
_VMEM_BUDGET = 24 * 1024 * 1024        # tile-footprint budget (fits all gens)
_VMEM_LIMIT = 32 * 1024 * 1024         # explicit scoped-VMEM limit


def _round_up(x, m):
    return ((x + m - 1) // m) * m


def _pad2d(x, rows, cols):
    pr, pc = rows - x.shape[0], cols - x.shape[1]
    if pr == 0 and pc == 0:
        return x
    return jnp.pad(x, ((0, pr), (0, pc)))


def _largest_fitting_tile(dim_pad, fits):
    """Largest multiple-of-128 divisor t of dim_pad with fits(t); floor 128."""
    t = dim_pad
    while t > _LANE and (dim_pad % t or not fits(t)):
        t -= _LANE
    return t


# ----------------------------------------------------------------------------
# Degree kernels (one-time per distinct adjacency block), both axes tiled.
# ----------------------------------------------------------------------------
def _colsum_kernel(a_ref, out_ref):
    @pl.when(pl.program_id(1) == 0)
    def _():
        out_ref[...] = jnp.zeros_like(out_ref)

    out_ref[...] += jnp.sum(a_ref[...].astype(jnp.float32), axis=0,
                            keepdims=True)


def _rowsum_kernel(a_ref, out_ref):
    @pl.when(pl.program_id(1) == 0)
    def _():
        out_ref[...] = jnp.zeros_like(out_ref)

    out_ref[...] += jnp.sum(a_ref[...].astype(jnp.float32), axis=1,
                            keepdims=True)


def _degrees(a_pad, tm, tk):
    nd_pad, ns_pad = a_pad.shape
    # src degrees = column sums; reduction over dst tiles (last, arbitrary).
    deg_src = pl.pallas_call(
        _colsum_kernel,
        out_shape=jax.ShapeDtypeStruct((1, ns_pad), jnp.float32),
        grid=(ns_pad // tk, nd_pad // tm),
        in_specs=[pl.BlockSpec((tm, tk), lambda j, i: (i, j))],
        out_specs=pl.BlockSpec((1, tk), lambda j, i: (0, j)),
        compiler_params=pltpu.CompilerParams(
            dimension_semantics=("parallel", "arbitrary"),
            vmem_limit_bytes=_VMEM_LIMIT),
    )(a_pad)
    # dst degrees = row sums; reduction over src tiles (last, arbitrary).
    deg_dst = pl.pallas_call(
        _rowsum_kernel,
        out_shape=jax.ShapeDtypeStruct((nd_pad, 1), jnp.float32),
        grid=(nd_pad // tm, ns_pad // tk),
        in_specs=[pl.BlockSpec((tm, tk), lambda i, k: (i, k))],
        out_specs=pl.BlockSpec((tm, 1), lambda i, k: (i, 0)),
        compiler_params=pltpu.CompilerParams(
            dimension_semantics=("parallel", "arbitrary"),
            vmem_limit_bytes=_VMEM_LIMIT),
    )(a_pad)
    return deg_src, deg_dst


def _prepare_graph(a):
    """Pick node tiles, pad A to tile multiples, cast bf16, compute D^-1/2 once."""
    n_dst, n_src = a.shape
    tm = min(_NODE_TILE, _round_up(n_dst, _LANE))
    tk = min(_NODE_TILE, _round_up(n_src, _LANE))
    nd_pad = _round_up(n_dst, tm)
    ns_pad = _round_up(n_src, tk)

    # 0/1 adjacency is exact in bf16; weighted adjacencies would lose precision.
    a_pad = _pad2d(a.astype(jnp.bfloat16), nd_pad, ns_pad)

    deg_src, deg_dst = _degrees(a_pad, tm, tk)
    # DGL norm='both' with degree clamp(min=1).
    c_src = lax.rsqrt(jnp.maximum(deg_src, 1.0)).reshape(ns_pad, 1)
    c_dst = lax.rsqrt(jnp.maximum(deg_dst, 1.0))            # (nd_pad, 1)
    return a_pad, c_src, c_dst, tm, tk


# ----------------------------------------------------------------------------
# Layer kernels.
# ----------------------------------------------------------------------------
def _transform_kernel(x_ref, w_ref, csrc_ref, h_ref):
    # H = (X @ W) * c_src   — f32 matmul/scale, stored bf16 for the MXU-native
    # bf16 x bf16 aggregate path.
    xw = jnp.dot(x_ref[...], w_ref[...], preferred_element_type=jnp.float32)
    h_ref[...] = (xw * csrc_ref[...]).astype(h_ref.dtype)


def _aggregate_kernel(a_ref, h_ref, cdst_ref, b_ref, o_ref, *, apply_relu):
    k = pl.program_id(2)

    @pl.when(k == 0)
    def _():
        o_ref[...] = jnp.zeros_like(o_ref)

    # bf16 x bf16 MXU matmul, f32 accumulation directly in the resident output
    # block (its index_map ignores k, so it stays in VMEM across the reduction).
    o_ref[...] += jnp.dot(a_ref[...], h_ref[...],
                          preferred_element_type=jnp.float32)

    @pl.when(k == pl.num_programs(2) - 1)
    def _():
        out = o_ref[...] * cdst_ref[...] + b_ref[...]
        if apply_relu:
            out = jnp.maximum(out, 0.0)
        o_ref[...] = out


def gcn_layer(a_pad, c_src, c_dst, tm, tk, x, w, b, apply_relu):
    nd_pad, ns_pad = a_pad.shape
    n_src, f_in = x.shape
    f_out = w.shape[1]
    assert n_src <= ns_pad

    fi_pad = _round_up(f_in, _LANE)
    fo_pad = _round_up(f_out, _LANE)

    x_p = _pad2d(x.astype(jnp.float32), ns_pad, fi_pad)
    w_p = _pad2d(w.astype(jnp.float32), fi_pad, fo_pad)
    b_p = _pad2d(b.astype(jnp.float32).reshape(1, f_out), 1, fo_pad)

    # ---- transform:  H = (X @ W) * c_src  -> bf16 ---------------------------
    tm_x = tk   # row tile over the src-node axis (ns_pad is a multiple of tk)

    def tf_fits(tn_t):
        return (2 * tm_x * fi_pad * 4 + 2 * fi_pad * tn_t * 4
                + 2 * tm_x * tn_t * 2 + 2 * tm_x * 4) <= _VMEM_BUDGET

    tn_t = _largest_fitting_tile(fo_pad, tf_fits)

    h = pl.pallas_call(
        _transform_kernel,
        out_shape=jax.ShapeDtypeStruct((ns_pad, fo_pad), jnp.bfloat16),
        grid=(ns_pad // tm_x, fo_pad // tn_t),
        in_specs=[
            pl.BlockSpec((tm_x, fi_pad), lambda i, j: (i, 0)),
            pl.BlockSpec((fi_pad, tn_t), lambda i, j: (0, j)),
            pl.BlockSpec((tm_x, 1), lambda i, j: (i, 0)),
        ],
        out_specs=pl.BlockSpec((tm_x, tn_t), lambda i, j: (i, j)),
        compiler_params=pltpu.CompilerParams(
            dimension_semantics=("parallel", "parallel"),
            vmem_limit_bytes=_VMEM_LIMIT),
        cost_estimate=pl.CostEstimate(
            flops=2 * ns_pad * fi_pad * fo_pad,
            transcendentals=0,
            bytes_accessed=(4 * ns_pad * fi_pad + 4 * fi_pad * fo_pad
                            + 2 * ns_pad * fo_pad)),
    )(x_p, w_p, c_src)

    # ---- aggregate:  O = relu?(c_dst * (A @ H) + b) -------------------------
    def agg_fits(tn):
        return (2 * tm * tn * 4        # resident f32 output (double-buffered)
                + 2 * tm * tk * 2      # A tiles, bf16
                + 2 * tk * tn * 2      # H tiles, bf16
                + 2 * tm * 4 + 2 * tn * 4) <= _VMEM_BUDGET

    # Full output width if it fits -> A streamed from HBM exactly once.
    tn = _largest_fitting_tile(fo_pad, agg_fits)

    kernel = functools.partial(_aggregate_kernel, apply_relu=apply_relu)
    out = pl.pallas_call(
        kernel,
        out_shape=jax.ShapeDtypeStruct((nd_pad, fo_pad), jnp.float32),
        grid=(nd_pad // tm, fo_pad // tn, ns_pad // tk),
        in_specs=[
            pl.BlockSpec((tm, tk), lambda i, j, k: (i, k)),
            pl.BlockSpec((tk, tn), lambda i, j, k: (k, j)),
            pl.BlockSpec((tm, 1), lambda i, j, k: (i, 0)),
            pl.BlockSpec((1, tn), lambda i, j, k: (0, j)),
        ],
        out_specs=pl.BlockSpec((tm, tn), lambda i, j, k: (i, j)),
        compiler_params=pltpu.CompilerParams(
            dimension_semantics=("parallel", "parallel", "arbitrary"),
            vmem_limit_bytes=_VMEM_LIMIT),
        cost_estimate=pl.CostEstimate(
            flops=2 * nd_pad * ns_pad * fo_pad,
            transcendentals=0,
            bytes_accessed=(2 * nd_pad * ns_pad * (fo_pad // tn)
                            + 2 * ns_pad * fo_pad * (nd_pad // tm)
                            + 4 * nd_pad * fo_pad)),
    )(a_pad, h, c_dst, b_p)

    return out  # padded (nd_pad, fo_pad), f32


def gcn_forward(bipartites, x, weights, biases, n_layers):
    """Mirrors GCN.forward: x = layer(bipartite, x); ReLU after all but last."""
    # Deduplicate adjacency blocks by object identity within this call so the
    # padded bf16 A and degree normalizers are computed once and reused.
    prepped, uniq = [], []
    for a in bipartites:
        hit = next((p for (a0, p) in uniq if a0 is a), None)
        if hit is None:
            hit = _prepare_graph(a)
            uniq.append((a, hit))
        prepped.append(hit)

    for l, (a, prep, w, b) in enumerate(zip(bipartites, prepped, weights,
                                            biases)):
        assert x.shape[0] == a.shape[1]
        a_pad, c_src, c_dst, tm, tk = prep
        out_pad = gcn_layer(a_pad, c_src, c_dst, tm, tk, x, w, b,
                            apply_relu=(l != n_layers - 1))
        x = out_pad[:a.shape[0], :w.shape[1]]
    return x


def gcn_reference(bipartites, x, weights, biases, n_layers):
    """Pure-JAX f32 reference for a correctness sanity check."""
    for l, (a, w, b) in enumerate(zip(bipartites, weights, biases)):
        c_src = jnp.maximum(a.sum(axis=0, keepdims=True), 1.0) ** -0.5
        c_dst = jnp.maximum(a.sum(axis=1, keepdims=True), 1.0) ** -0.5
        x = (c_dst * (a * c_src)) @ (x @ w) + b.reshape(1, -1)
        if l != n_layers - 1:
            x = jnp.maximum(x, 0.0)
    return x


if __name__ == "__main__":
    # Module hyperparameters (small).
    in_feats, n_hidden, n_classes, n_layers = 16, 32, 8, 3
    n_nodes = 64  # src == dst node count for every bipartite block

    key = jax.random.PRNGKey(0)
    k_adj, k_x, *k_params = jax.random.split(key, 2 + 2 * n_layers)

    # Deterministic random binary adjacency with self loops, reused as every
    # "bipartite" block (degree/normalizer computation is then shared).
    adj = (jax.random.uniform(k_adj, (n_nodes, n_nodes)) < 0.1).astype(jnp.float32)
    adj = jnp.maximum(adj, jnp.eye(n_nodes, dtype=jnp.float32))
    bipartites = [adj for _ in range(n_layers)]

    # Glorot-style weights + small biases, matching GraphConv parameter shapes.
    dims = [in_feats] + [n_hidden] * (n_layers - 1) + [n_classes]
    weights, biases = [], []
    for l in range(n_layers):
        f_i, f_o = dims[l], dims[l + 1]
        scale = (6.0 / (f_i + f_o)) ** 0.5
        w = jax.random.uniform(k_params[2 * l], (f_i, f_o),
                               minval=-scale, maxval=scale, dtype=jnp.float32)
        b = 0.01 * jax.random.normal(k_params[2 * l + 1], (1, f_o),
                                     dtype=jnp.float32)
        weights.append(w)
        biases.append(b)

    x = jax.random.normal(k_x, (n_nodes, in_feats), dtype=jnp.float32)

    out = gcn_forward(bipartites, x, weights, biases, n_layers)
    out = jax.block_until_ready(out)

    ref = gcn_reference(bipartites, x, weights, biases, n_layers)
    assert out.shape == (n_nodes, n_classes)
    # Tolerance loosened vs the pure-f32 reference: H is carried in bf16 on the
    # MXU-native path (accumulation stays f32; 0/1 A is exact in bf16).
    assert jnp.allclose(out, ref, atol=5e-2, rtol=5e-2)

    print("KERNEL_OK")
</pallas_src>

<mosaic_0001>
module attributes {stable_mosaic.version = 11 : i64} {
  func.func @_colsum_kernel(%arg0: i32, %arg1: i32, %arg2: memref<128x128xbf16, #tpu.memory_space<vmem>>, %arg3: memref<1x128xf32, #tpu.memory_space<vmem>>) attributes {dimension_semantics = [#tpu.dimension_semantics<parallel>, #tpu.dimension_semantics<arbitrary>], iteration_bounds = array<i64: 1, 1>, scalar_prefetch = 0 : i64, scratch_operands = 0 : i64, tpu.core_type = #tpu.core_type<tc>, window_params = [{transform_indices = @transform_0, window_bounds = array<i64: 128, 128>}, {transform_indices = @transform_1, window_bounds = array<i64: 1, 128>}]} {
    %c0_i32 = arith.constant 0 : i32
    %0 = arith.cmpi eq, %arg1, %c0_i32 : i32
    %1 = arith.extui %0 : i1 to i32
    %c0_i32_0 = arith.constant 0 : i32
    %2 = arith.cmpi ne, %1, %c0_i32_0 : i32
    scf.if %2 {
      %cst_6 = arith.constant 0.000000e+00 : f32
      %10 = vector.broadcast %cst_6 : f32 to vector<1x128xf32>
      %c0_7 = arith.constant 0 : index
      %c0_8 = arith.constant 0 : index
      %11 = vector.load %arg3[%c0_7, %c0_8] : memref<1x128xf32, #tpu.memory_space<vmem>>, vector<1x128xf32>
      tpu.vector_store %arg3[%c0_7, %c0_8], %10 {strides = array<i32>} : memref<1x128xf32, #tpu.memory_space<vmem>>, vector<1x128xf32>,
    } else {
    }
    %c0 = arith.constant 0 : index
    %c0_1 = arith.constant 0 : index
    %3 = vector.load %arg3[%c0, %c0_1] : memref<1x128xf32, #tpu.memory_space<vmem>>, vector<1x128xf32>
    %c0_2 = arith.constant 0 : index
    %c0_3 = arith.constant 0 : index
    %4 = vector.load %arg2[%c0_2, %c0_3] : memref<128x128xbf16, #tpu.memory_space<vmem>>, vector<128x128xbf16>
    %5 = arith.extf %4 : vector<128x128xbf16> to vector<128x128xf32>
    %cst = arith.constant dense<0.000000e+00> : vector<128xf32>
    %6 = vector.multi_reduction <add>, %5, %cst [0] : vector<128x128xf32> to vector<128xf32>
    %7 = vector.shape_cast %6 : vector<128xf32> to vector<1x128xf32>
    %8 = arith.addf %3, %7 : vector<1x128xf32>
    %c0_4 = arith.constant 0 : index
    %c0_5 = arith.constant 0 : index
    %9 = vector.load %arg3[%c0_4, %c0_5] : memref<1x128xf32, #tpu.memory_space<vmem>>, vector<1x128xf32>
    tpu.vector_store %arg3[%c0_4, %c0_5], %8 {strides = array<i32>} : memref<1x128xf32, #tpu.memory_space<vmem>>, vector<1x128xf32>,
    return
  }
  func.func @transform_0(%arg0: i32, %arg1: i32) -> (i32, i32) {
    %c0_i32 = arith.constant 0 : i32
    return %arg1, %arg0 : i32, i32
  }
  func.func @transform_1(%arg0: i32, %arg1: i32) -> (i32, i32) {
    %c0_i32 = arith.constant 0 : i32
    %c0_i32_0 = arith.constant 0 : i32
    return %c0_i32, %arg0 : i32, i32
  }
}

</mosaic_0001>

<bundles_post_ra>
// kernel: tpu_custom_call.1
= control target key start
LH: loop header
LB: loop body
LE: loop exit
PB: predicated region body
PF: predicated region fallthrough
CT: control target
= control target key end

     0   :  { %6 = vsyncpa [#allocation3], 0  ;;  %s208_s0 = inlined_call_operand.hbm [shape: bf16[128,128], index: 0, kind: input, shape index: {}]   ;;  %s209_s1 = inlined_call_operand.hbm [shape: f32[1,128], index: 1, kind: output, shape index: {}]  }
   0x1   :  { %7 = vsyncpa [#allocation4], 0  ;;  %s187_s6 = smov [#allocation2]  }
   0x2   :  { %s13_s7 = sshll.u32 %s187_s6, 4  ;;  %s14_s7 = int_to_ptr.vmem [resolvable:$true] %s13_s7 }
   0x3   :  { %s151_s8 = scalar_lea.vmem %s14_s7, 1024  ;;  %p156_p1 = scmp.lt.s32.totalorder %s14_s7, %s14_s7 }
   0x4   :  { %p152_p0 = scmp.ne.s32.totalorder %s14_s7, %s151_s8  ;;  %p157_p2 = scmp.lt.s32.totalorder %s151_s8, %s151_s8 }
   0x6   :  { %p158_p3 = por %p157_p2, %p156_p1 }
   0x8   :  { %p159_p4 = pnand %p158_p3, %p152_p0 }
   0xa   :  { %162 = shalt.err (!%p159_p4)
}
   0xb   :  { %s188_s9 = smov 64   ;;  %s189_s10 = smov 4  }
   0xc   :  { %19 = dma.hbm_to_vmem [thread:$0]  %s208_s0, 1024, %s14_s7, [#allocation3], %s188_s9, %s188_s9, %s189_s10  }
   0xd   :  { %183 = dma.done.wait [#allocation3], 1024  }
   0xe   :  { %184 = vsyncadd [#allocation3], 4294966272  ;;  %v190_v0 = vmov 0.0   ;;  %v100_v1 = vld [vmem:[#allocation2] sm:$0xff]   ;;  %v131_v2 = vld [vmem:[#allocation2 + $0x8] sm:$0xff]   ;;  %s191_s0 = smov [#allocation5]  }
   0xf   :  { %27 = vst [vmem:[#allocation5] sm:$0x1] %v190_v0  ;;  %v101_v3 = vunpack.c.l.bf16 %v100_v1  ;;  %v102_v4 = vunpack.c.h.bf16 %v100_v1  ;;  %v105_v5 = vunpack.c.l.bf16 %v131_v2  ;;  %v132_v6 = vld [vmem:[#allocation2 + $0x10] sm:$0xff]   ;;  %v106_v7 = vunpack.c.h.bf16 %v131_v2  ;;  %v133_v11 = vld [vmem:[#allocation2 + $0x18] sm:$0xff]   ;;  %v134_v16 = vld [vmem:[#allocation2 + $0x20] sm:$0xff]   ;;  %s90_s13 = sshll.u32 %s191_s0, 4  ;;  %s91_s13 = int_to_ptr.vmem [resolvable:$true] %s90_s13 }
  0x10   :  { %v109_v9 = vunpack.c.l.bf16 %v132_v6  ;;  %v110_v12 = vunpack.c.h.bf16 %v132_v6  ;;  %v113_v14 = vunpack.c.l.bf16 %v133_v11  ;;  %v114_v17 = vunpack.c.h.bf16 %v133_v11  ;;  %v135_v21 = vld [vmem:[#allocation2 + $0x28] sm:$0xff]   ;;  %v136_v26 = vld [vmem:[#allocation2 + $0x30] sm:$0xff]   ;;  %v137_v31 = vld [vmem:[#allocation2 + $0x38] sm:$0xff]   ;;  %s163_s14 = scalar_lea.vmem %s91_s13, 16  ;;  %s167_s15 = scalar_lea.vmem %s91_s13, 32 }
  0x11   :  { %v61_v8 = vadd.f32 %v102_v4, %v101_v3  ;;  %v117_v19 = vunpack.c.l.bf16 %v134_v16  ;;  %v118_v22 = vunpack.c.h.bf16 %v134_v16  ;;  %v121_v24 = vunpack.c.l.bf16 %v135_v21  ;;  %p164_p5 = scmp.ne.s32.totalorder %s91_s13, %s163_s14  ;;  %p168_p6 = scmp.lt.s32.totalorder %s91_s13, %s91_s13 }
  0x12   :  { %v122_v27 = vunpack.c.h.bf16 %v135_v21  ;;  %v125_v29 = vunpack.c.l.bf16 %v136_v26  ;;  %v126_v32 = vunpack.c.h.bf16 %v136_v26  ;;  %v129_v34 = vunpack.c.l.bf16 %v137_v31  ;;  %p169_p7 = scmp.lt.s32.totalorder %s167_s15, %s163_s14 }
  0x13   :  { %v62_v10 = vadd.f32 %v105_v5, %v61_v8  ;;  %v130_v36 = vunpack.c.h.bf16 %v137_v31 }
  0x14   :  { %p170_p8 = por %p169_p7, %p168_p6 }
  0x15   :  { %v63_v13 = vadd.f32 %v106_v7, %v62_v10 }
  0x16   :  { %v28_v45 = vld [vmem:[#allocation5] sm:$0x1]  ;;  %p171_p9 = pnand %p170_p8, %p164_p5 }
  0x17   :  { %v64_v15 = vadd.f32 %v109_v9, %v63_v13 }
  0x19   :  { %v65_v18 = vadd.f32 %v110_v12, %v64_v15 }
  0x1b   :  { %v66_v20 = vadd.f32 %v113_v14, %v65_v18 }
  0x1d   :  { %v67_v23 = vadd.f32 %v114_v17, %v66_v20 }
  0x1f   :  { %v68_v25 = vadd.f32 %v117_v19, %v67_v23 }
  0x21   :  { %v69_v28 = vadd.f32 %v118_v22, %v68_v25 }
  0x23   :  { %v70_v30 = vadd.f32 %v121_v24, %v69_v28 }
  0x25   :  { %v71_v33 = vadd.f32 %v122_v27, %v70_v30 }
  0x27   :  { %v72_v35 = vadd.f32 %v125_v29, %v71_v33 }
  0x29   :  { %v73_v37 = vadd.f32 %v126_v32, %v72_v35 }
  0x2b   :  { %v74_v38 = vadd.f32 %v129_v34, %v73_v37 }
  0x2d   :  { %v75_v39 = vadd.f32 %v130_v36, %v74_v38 }
  0x2f   :  { %v76_v40 = vrot.slane %v75_v39, 4 }
  0x31   :  { %v77_v41 = vadd.f32 %v76_v40, %v75_v39 }
  0x33   :  { %v78_v42 = vrot.slane %v77_v41, 2 }
  0x35   :  { %v79_v43 = vadd.f32 %v78_v42, %v77_v41 }
  0x37   :  { %v80_v44 = vrot.slane %v79_v43, 1 }
  0x39   :  { %v81_v46 = vadd.f32 %v80_v44, %v79_v43 }
  0x3b   :  { %v82_v47 = vadd.f32 %v81_v46, %v28_v45 }
  0x3d   :  { %83 = vst [vmem:[#allocation5] sm:$0x1] %v82_v47 }
  0x3e   :  { %174 = shalt.err (!%p171_p9)
}
  0x3f   :  { %93 = dma.vmem_to_hbm [thread:$0]  %s91_s13, 16, %s209_s1, [#allocation4]  }
  0x40   :  { %185 = dma.done.wait [#allocation4], 16  }
  0x41   :  { %186 = vsyncadd [#allocation4], 4294967280 }
  0x42   :  { %97 = vsyncpa [#allocation3], 1 }
  0x43   :  { %98 = vsyncpa [#allocation4], 1 }

</bundles_post_ra>
